<compile_context>
chip_gen: v7x
topology: tpu7x:2x2x1
jax: 0.10.0
libtpu: 0.0.40
codegen_flags: <defaults>
</compile_context>

<pallas_src>
import functools

import jax
import jax.numpy as jnp
from jax.experimental import pallas as pl
from jax.experimental.pallas import tpu as pltpu

SUBLANE = 8
# If the double-buffered resident parameter footprint exceeds this, fall back
# to single-buffering the grid-invariant params (~1/3 of v7x's 64 MiB VMEM).
_PARAM_RESIDENT_BUDGET = 24 * 2**20

_ACTIVATIONS = {
    "sig": jax.nn.sigmoid,
    "tanh": jnp.tanh,
    "relu": jax.nn.relu,
}


def _round_up(n, m):
    return ((n + m - 1) // m) * m


def _cdiv(a, b):
    return (a + b - 1) // b


@functools.lru_cache(maxsize=None)
def _elementwise_bf16_ok():
    """bf16 VPU/EUP exists on v6e/v7x; keep f32 elementwise math on v5e & older."""
    try:
        kind = jax.devices()[0].device_kind.lower()
    except Exception:
        return False
    return any(tag in kind for tag in ("v6", "v7", "7x"))


def _choose_batch_tile(batch, max_tb=1024):
    """Batch tile choice:
      * tiny batch -> one block (launch-overhead regime, no padding/slice),
      * batch >= 512 -> >= 2 roughly equal tiles so both v7x TensorCores get
        work, capped at 1024 rows and sized to minimise batch padding."""
    if batch < 512:
        return _round_up(batch, SUBLANE)
    n_tiles = max(2, _cdiv(batch, max_tb))
    return _round_up(_cdiv(batch, n_tiles), SUBLANE)


def _make_mlp_kernel(num_layers, compute_dtype, ew_dtype, act):
    """Fused MLP kernel: refs = (x_ref, w0, b0, w1, b1, ..., out_ref)."""
    act_fn = _ACTIVATIONS[act]

    def kernel(*refs):
        x_ref = refs[0]
        out_ref = refs[-1]
        param_refs = refs[1:-1]
        assert len(param_refs) == 2 * num_layers

        # Cast activations to the MXU compute dtype inside the kernel — keeps
        # the wrapper free of extra XLA launches / HBM copies.
        h = x_ref[...].astype(compute_dtype)
        for k in range(num_layers):
            w = param_refs[2 * k][...]        # (in_k, out_k), compute_dtype
            b = param_refs[2 * k + 1][...]    # (1, out_k), f32
            z = jnp.dot(h, w, preferred_element_type=jnp.float32) + b
            a = act_fn(z.astype(ew_dtype))    # bf16 EUP on v6e/v7x, f32 on v5e
            h = a.astype(compute_dtype) if k < num_layers - 1 else a
        out_ref[...] = h.astype(out_ref.dtype)

    return kernel


@functools.partial(jax.jit, static_argnames=("elementwise_bf16", "act"))
def _net_forward_impl(x, params, *, elementwise_bf16, act):
    num_layers = len(params) // 2
    batch, in_features = x.shape
    out_features = params[-1].shape[-1]
    compute_dtype = params[0].dtype
    ew_dtype = jnp.bfloat16 if elementwise_bf16 else jnp.float32

    # ---- batch tiling (feature dims are NOT padded: full-dim blocks) ----
    tb = _choose_batch_tile(batch)
    batch_pad = _round_up(batch, tb)
    xp = x
    if batch_pad != batch:
        xp = jnp.zeros((batch_pad, in_features), x.dtype).at[:batch].set(x)
    grid = (batch_pad // tb,)

    # ---- VMEM-resident parameters (real shapes, constant index_map) ----
    param_bytes = sum(int(p.size) * p.dtype.itemsize for p in params)
    single_buffer_params = 2 * param_bytes > _PARAM_RESIDENT_BUDGET
    # TODO(synk): if param_bytes alone exceeds ~24 MiB (large hidden sizes on
    # v7x's 64 MiB VMEM), switch to per-layer K/N weight tiling instead of
    # keeping every layer's weights resident.
    param_spec_kwargs = (
        {"pipeline_mode": pl.Buffered(1)} if single_buffer_params else {}
    )

    in_specs = [pl.BlockSpec((tb, in_features), lambda i: (i, 0))]
    for k in range(num_layers):
        w, b = params[2 * k], params[2 * k + 1]
        in_specs.append(pl.BlockSpec(w.shape, lambda i: (0, 0), **param_spec_kwargs))
        in_specs.append(pl.BlockSpec(b.shape, lambda i: (0, 0), **param_spec_kwargs))
    out_specs = pl.BlockSpec((tb, out_features), lambda i: (i, 0))

    # ---- cost estimate from real (unpadded-feature) dims ----
    flops = 2 * batch_pad * sum(int(w.shape[0] * w.shape[1]) for w in params[0::2])
    transcendentals = batch_pad * sum(int(w.shape[1]) for w in params[0::2])
    bytes_accessed = (
        int(xp.size) * xp.dtype.itemsize + param_bytes + batch_pad * out_features * 4
    )

    # ---- VMEM budget sized to actual buffers + headroom ----
    widths = [in_features] + [int(w.shape[1]) for w in params[0::2]]
    vmem_est = (
        (1 if single_buffer_params else 2) * param_bytes
        + 2 * tb * in_features * xp.dtype.itemsize   # double-buffered x blocks
        + 2 * tb * out_features * 4                  # double-buffered out blocks
        + 6 * tb * max(widths) * 4                   # z / a / h temporaries
    )
    vmem_limit_bytes = int(min(max(vmem_est, 32 * 2**20), 56 * 2**20))

    kernel = _make_mlp_kernel(num_layers, compute_dtype, ew_dtype, act)

    out = pl.pallas_call(
        kernel,
        out_shape=jax.ShapeDtypeStruct((batch_pad, out_features), jnp.float32),
        grid=grid,
        in_specs=in_specs,
        out_specs=out_specs,
        compiler_params=pltpu.CompilerParams(
            dimension_semantics=("parallel",),
            vmem_limit_bytes=vmem_limit_bytes,
        ),
        cost_estimate=pl.CostEstimate(
            flops=flops,
            transcendentals=transcendentals,
            bytes_accessed=bytes_accessed,
        ),
    )(xp, *params)

    if batch_pad != batch:
        out = out[:batch]
    return out


def prepare_params(params, use_bf16=True):
    """One-time parameter preparation (hoisted OUT of the forward hot path):
    weights cast to the MXU compute dtype, biases kept f32 with shape (1, out)."""
    compute_dtype = jnp.bfloat16 if use_bf16 else jnp.float32
    prepared = []
    for k in range(len(params) // 2):
        w, b = params[2 * k], params[2 * k + 1]
        prepared.append(jnp.asarray(w, compute_dtype))
        prepared.append(jnp.asarray(b, jnp.float32).reshape(1, -1))
    return tuple(prepared)


def net_forward(x, prepared_params, act="sig"):
    """Fused MLP forward. Hot path = exactly one pallas_call for aligned batch."""
    compute_is_bf16 = prepared_params[0].dtype == jnp.bfloat16
    ew_bf16 = compute_is_bf16 and _elementwise_bf16_ok()
    return _net_forward_impl(x, prepared_params, elementwise_bf16=ew_bf16, act=act)


def init_net_params(key, layers_size, out_size):
    """uniform(-1, 1) init matching nn.init.uniform_(a=-1, b=1); weights stored
    transposed to (in_features, out_features)."""
    dims = list(layers_size) + [out_size]
    params = []
    for k in range(len(dims) - 1):
        key, kw, kb = jax.random.split(key, 3)
        w = jax.random.uniform(kw, (dims[k], dims[k + 1]), jnp.float32, -1.0, 1.0)
        b = jax.random.uniform(kb, (1, dims[k + 1]), jnp.float32, -1.0, 1.0)
        params.append(w)
        params.append(b)
    return tuple(params)


def net_forward_ref(x, params):
    """Pure-JAX f32 reference of the forward pass (act='sig')."""
    h = x
    for k in range(len(params) // 2):
        h = jax.nn.sigmoid(h @ params[2 * k] + params[2 * k + 1])
    return h


def net_forward_ref_mixed(x, params, compute_dtype, ew_dtype):
    """Pure-JAX reference mirroring the kernel's mixed-precision path."""
    n = len(params) // 2
    h = x.astype(compute_dtype)
    for k in range(n):
        w = params[2 * k].astype(compute_dtype)
        b = params[2 * k + 1]
        z = jnp.dot(h, w, preferred_element_type=jnp.float32) + b
        a = jax.nn.sigmoid(z.astype(ew_dtype))
        h = a.astype(compute_dtype) if k < n - 1 else a
    return h.astype(jnp.float32)


if __name__ == "__main__":
    # Net(layers_size=[16, 32, 32], out_size=8), act='sig', batch=8
    # TODO(synk): save_int / internal_rep (stateful Python-list activation
    # logging) has no Pallas equivalent and is not implemented.
    layers_size = [16, 32, 32]
    out_size = 8
    batch = 8

    key = jax.random.PRNGKey(0)
    key, kx = jax.random.split(key)
    x = jax.random.uniform(kx, (batch, layers_size[0]), jnp.float32, -1.0, 1.0)
    raw_params = init_net_params(key, layers_size, out_size)

    # Parameters are prepared ONCE (cast / reshape), outside the hot path.
    params_bf16 = prepare_params(raw_params, use_bf16=True)
    params_f32 = prepare_params(raw_params, use_bf16=False)

    out = jax.block_until_ready(net_forward(x, params_bf16))
    assert out.shape == (batch, out_size)

    # Tight check against a reference with identical mixed precision.
    ew_dtype = jnp.bfloat16 if _elementwise_bf16_ok() else jnp.float32
    ref_mixed = net_forward_ref_mixed(x, raw_params, jnp.bfloat16, ew_dtype)
    assert jnp.allclose(out, ref_mixed, atol=1e-2, rtol=1e-2), "mismatch vs mixed ref"

    # Coarser check against the pure-f32 reference (bf16 rounding only).
    ref_f32 = net_forward_ref(x, raw_params)
    assert jnp.allclose(out, ref_f32, atol=5e-2, rtol=0), "mismatch vs f32 reference"

    # Full-precision kernel path should match the f32 reference tightly.
    out_f32 = jax.block_until_ready(net_forward(x, params_f32))
    assert jnp.allclose(out_f32, ref_f32, atol=1e-5, rtol=1e-5), "f32 kernel mismatch"

    print("KERNEL_OK")
</pallas_src>

<mosaic_0001>
module attributes {stable_mosaic.version = 11 : i64} {
  func.func @kernel(%arg0: i32, %arg1: memref<8x16xf32, #tpu.memory_space<vmem>>, %arg2: memref<16x32xbf16, #tpu.memory_space<vmem>>, %arg3: memref<1x32xf32, #tpu.memory_space<vmem>>, %arg4: memref<32x32xbf16, #tpu.memory_space<vmem>>, %arg5: memref<1x32xf32, #tpu.memory_space<vmem>>, %arg6: memref<32x8xbf16, #tpu.memory_space<vmem>>, %arg7: memref<1x8xf32, #tpu.memory_space<vmem>>, %arg8: memref<8x8xf32, #tpu.memory_space<vmem>>) attributes {dimension_semantics = [#tpu.dimension_semantics<parallel>], iteration_bounds = array<i64: 1>, scalar_prefetch = 0 : i64, scratch_operands = 0 : i64, tpu.core_type = #tpu.core_type<tc>, window_params = [{transform_indices = @transform_0, window_bounds = array<i64: 8, 16>}, {pipeline_mode = #tpu.pipeline_mode<synchronous>, transform_indices = @transform_1, window_bounds = array<i64: 16, 32>}, {pipeline_mode = #tpu.pipeline_mode<synchronous>, transform_indices = @transform_2, window_bounds = array<i64: 1, 32>}, {pipeline_mode = #tpu.pipeline_mode<synchronous>, transform_indices = @transform_3, window_bounds = array<i64: 32, 32>}, {pipeline_mode = #tpu.pipeline_mode<synchronous>, transform_indices = @transform_4, window_bounds = array<i64: 1, 32>}, {pipeline_mode = #tpu.pipeline_mode<synchronous>, transform_indices = @transform_5, window_bounds = array<i64: 32, 8>}, {pipeline_mode = #tpu.pipeline_mode<synchronous>, transform_indices = @transform_6, window_bounds = array<i64: 1, 8>}, {transform_indices = @transform_7, window_bounds = array<i64: 8, 8>}]} {
    %c0 = arith.constant 0 : index
    %c0_0 = arith.constant 0 : index
    %0 = vector.load %arg1[%c0, %c0_0] : memref<8x16xf32, #tpu.memory_space<vmem>>, vector<8x16xf32>
    %1 = arith.truncf %0 : vector<8x16xf32> to vector<8x16xbf16>
    %c0_1 = arith.constant 0 : index
    %c0_2 = arith.constant 0 : index
    %2 = vector.load %arg2[%c0_1, %c0_2] : memref<16x32xbf16, #tpu.memory_space<vmem>>, vector<16x32xbf16>
    %c0_3 = arith.constant 0 : index
    %c0_4 = arith.constant 0 : index
    %3 = vector.load %arg3[%c0_3, %c0_4] : memref<1x32xf32, #tpu.memory_space<vmem>>, vector<1x32xf32>
    %cst = arith.constant dense<0.000000e+00> : vector<8x32xf32>
    %4 = tpu.matmul %1, %2, %cst {dimension_numbers = #tpu.dot_dimension_numbers<[1], [0], [0], [1], [0, 0, 1, 1], [], []>} : vector<8x16xbf16>, vector<16x32xbf16>, vector<8x32xf32> -> vector<8x32xf32>
    %5 = vector.broadcast %3 : vector<1x32xf32> to vector<8x32xf32>
    %6 = arith.addf %4, %5 : vector<8x32xf32>
    %7 = arith.negf %6 : vector<8x32xf32>
    %8 = math.exp %7 : vector<8x32xf32>
    %cst_5 = arith.constant 1.000000e+00 : f32
    %9 = vector.broadcast %cst_5 : f32 to vector<8x32xf32>
    %10 = arith.addf %9, %8 : vector<8x32xf32>
    %11 = arith.divf %9, %10 : vector<8x32xf32>
    %12 = arith.truncf %11 : vector<8x32xf32> to vector<8x32xbf16>
    %c0_6 = arith.constant 0 : index
    %c0_7 = arith.constant 0 : index
    %13 = vector.load %arg4[%c0_6, %c0_7] : memref<32x32xbf16, #tpu.memory_space<vmem>>, vector<32x32xbf16>
    %c0_8 = arith.constant 0 : index
    %c0_9 = arith.constant 0 : index
    %14 = vector.load %arg5[%c0_8, %c0_9] : memref<1x32xf32, #tpu.memory_space<vmem>>, vector<1x32xf32>
    %cst_10 = arith.constant dense<0.000000e+00> : vector<8x32xf32>
    %15 = tpu.matmul %12, %13, %cst_10 {dimension_numbers = #tpu.dot_dimension_numbers<[1], [0], [0], [1], [0, 0, 1, 1], [], []>} : vector<8x32xbf16>, vector<32x32xbf16>, vector<8x32xf32> -> vector<8x32xf32>
    %16 = vector.broadcast %14 : vector<1x32xf32> to vector<8x32xf32>
    %17 = arith.addf %15, %16 : vector<8x32xf32>
    %18 = arith.negf %17 : vector<8x32xf32>
    %19 = math.exp %18 : vector<8x32xf32>
    %cst_11 = arith.constant 1.000000e+00 : f32
    %20 = vector.broadcast %cst_11 : f32 to vector<8x32xf32>
    %21 = arith.addf %20, %19 : vector<8x32xf32>
    %22 = arith.divf %20, %21 : vector<8x32xf32>
    %23 = arith.truncf %22 : vector<8x32xf32> to vector<8x32xbf16>
    %c0_12 = arith.constant 0 : index
    %c0_13 = arith.constant 0 : index
    %24 = vector.load %arg6[%c0_12, %c0_13] : memref<32x8xbf16, #tpu.memory_space<vmem>>, vector<32x8xbf16>
    %c0_14 = arith.constant 0 : index
    %c0_15 = arith.constant 0 : index
    %25 = vector.load %arg7[%c0_14, %c0_15] : memref<1x8xf32, #tpu.memory_space<vmem>>, vector<1x8xf32>
    %cst_16 = arith.constant dense<0.000000e+00> : vector<8x8xf32>
    %26 = tpu.matmul %23, %24, %cst_16 {dimension_numbers = #tpu.dot_dimension_numbers<[1], [0], [0], [1], [0, 0, 1, 1], [], []>} : vector<8x32xbf16>, vector<32x8xbf16>, vector<8x8xf32> -> vector<8x8xf32>
    %27 = vector.broadcast %25 : vector<1x8xf32> to vector<8x8xf32>
    %28 = arith.addf %26, %27 : vector<8x8xf32>
    %29 = arith.negf %28 : vector<8x8xf32>
    %30 = math.exp %29 : vector<8x8xf32>
    %cst_17 = arith.constant 1.000000e+00 : f32
    %31 = vector.broadcast %cst_17 : f32 to vector<8x8xf32>
    %32 = arith.addf %31, %30 : vector<8x8xf32>
    %33 = arith.divf %31, %32 : vector<8x8xf32>
    %c0_18 = arith.constant 0 : index
    %c0_19 = arith.constant 0 : index
    %34 = vector.load %arg8[%c0_18, %c0_19] : memref<8x8xf32, #tpu.memory_space<vmem>>, vector<8x8xf32>
    tpu.vector_store %arg8[%c0_18, %c0_19], %33 {strides = array<i32>} : memref<8x8xf32, #tpu.memory_space<vmem>>, vector<8x8xf32>,
    return
  }
  func.func @transform_0(%arg0: i32) -> (i32, i32) {
    %c0_i32 = arith.constant 0 : i32
    %c0_i32_0 = arith.constant 0 : i32
    return %arg0, %c0_i32 : i32, i32
  }
  func.func @transform_1(%arg0: i32) -> (i32, i32) {
    %c0_i32 = arith.constant 0 : i32
    %c0_i32_0 = arith.constant 0 : i32
    %c0_i32_1 = arith.constant 0 : i32
    return %c0_i32, %c0_i32_0 : i32, i32
  }
  func.func @transform_2(%arg0: i32) -> (i32, i32) {
    %c0_i32 = arith.constant 0 : i32
    %c0_i32_0 = arith.constant 0 : i32
    %c0_i32_1 = arith.constant 0 : i32
    return %c0_i32, %c0_i32_0 : i32, i32
  }
  func.func @transform_3(%arg0: i32) -> (i32, i32) {
    %c0_i32 = arith.constant 0 : i32
    %c0_i32_0 = arith.constant 0 : i32
    %c0_i32_1 = arith.constant 0 : i32
    return %c0_i32, %c0_i32_0 : i32, i32
  }
  func.func @transform_4(%arg0: i32) -> (i32, i32) {
    %c0_i32 = arith.constant 0 : i32
    %c0_i32_0 = arith.constant 0 : i32
    %c0_i32_1 = arith.constant 0 : i32
    return %c0_i32, %c0_i32_0 : i32, i32
  }
  func.func @transform_5(%arg0: i32) -> (i32, i32) {
    %c0_i32 = arith.constant 0 : i32
    %c0_i32_0 = arith.constant 0 : i32
    %c0_i32_1 = arith.constant 0 : i32
    return %c0_i32, %c0_i32_0 : i32, i32
  }
  func.func @transform_6(%arg0: i32) -> (i32, i32) {
    %c0_i32 = arith.constant 0 : i32
    %c0_i32_0 = arith.constant 0 : i32
    %c0_i32_1 = arith.constant 0 : i32
    return %c0_i32, %c0_i32_0 : i32, i32
  }
  func.func @transform_7(%arg0: i32) -> (i32, i32) {
    %c0_i32 = arith.constant 0 : i32
    %c0_i32_0 = arith.constant 0 : i32
    return %arg0, %c0_i32 : i32, i32
  }
}

</mosaic_0001>

<bundles_post_ra>
// kernel: _net_forward_impl.1
= control target key start
LH: loop header
LB: loop body
LE: loop exit
PB: predicated region body
PF: predicated region fallthrough
CT: control target
= control target key end

     0   :  { %12 = vsyncpa [#allocation3], 0  ;;  %s484_s0 = inlined_call_operand.vmem [shape: f32[8,16], index: 0, kind: input, shape index: {}]   ;;  %s485_s1 = inlined_call_operand.hbm [shape: bf16[16,32], index: 1, kind: input, shape index: {}]   ;;  %s486_s2 = inlined_call_operand.vmem [shape: f32[1,32], index: 2, kind: input, shape index: {}]   ;;  %s487_s3 = inlined_call_operand.vmem [shape: bf16[32,32], index: 3, kind: input, shape index: {}]   ;;  %s488_s4 = inlined_call_operand.vmem [shape: f32[1,32], index: 4, kind: input, shape index: {}]   ;;  %s489_s5 = inlined_call_operand.vmem [shape: bf16[32,8], index: 5, kind: input, shape index: {}]   ;;  %s490_s6 = inlined_call_operand.vmem [shape: f32[1,8], index: 6, kind: input, shape index: {}]   ;;  %s491_s7 = inlined_call_operand.hbm [shape: f32[8,8], index: 7, kind: output, shape index: {}]  }
   0x1   :  { %13 = vsyncpa [#allocation4], 0  ;;  %s388_s24 = smov [#allocation2]   ;;  %s340_s28 = scalar_lea.hbm %s485_s1, 128 }
   0x2   :  { %s21_s25 = sshll.u32 %s388_s24, 4  ;;  %p341_p0 = scmp.ne.s32.totalorder %s485_s1, %s340_s28  ;;  %s22_s25 = int_to_ptr.vmem [resolvable:$true] %s21_s25 }
   0x3   :  { %p344_p1 = scmp.lt.u32.totalorder %s340_s28, %s485_s1 }
   0x5   :  { %p346_p2 = pnand %p344_p1, %p341_p0 }
   0x7   :  { %349 = shalt.err (!%p346_p2)
}
   0x8   :  { %s350_s10 = scalar_lea.vmem %s22_s25, 128  ;;  %p355_p4 = scmp.lt.s32.totalorder %s22_s25, %s22_s25 }
   0x9   :  { %p351_p3 = scmp.ne.s32.totalorder %s22_s25, %s350_s10  ;;  %p356_p5 = scmp.lt.s32.totalorder %s350_s10, %s350_s10 }
   0xb   :  { %p357_p6 = por %p356_p5, %p355_p4 }
   0xd   :  { %p358_p7 = pnand %p357_p6, %p351_p3 }
   0xf   :  { %361 = shalt.err (!%p358_p7)
}
  0x10   :  { %s389_s11 = smov 64   ;;  %s390_s12 = smov 4  }
  0x11   :  { %27 = dma.hbm_to_vmem [thread:$0]  %s485_s1, 128, %s22_s25, [#allocation3], %s389_s11, %s389_s11, %s390_s12  }
  0x12   :  { %384 = dma.done.wait [#allocation3], 128  }
  0x13   :  { %385 = vsyncadd [#allocation3], 4294967168  ;;  %v391_v0 = vmov 0.0   ;;  %vm392_vm0 = vmmov 0   ;;  %v323_v1 = vld [vmem:[#allocation2] sm:$0xff]   ;;  %vm59_vm1 = vcmask 130048  }
  0x14   :  { %295 = vmatprep.subr.bf16.mxu0 %v391_v0  ;;  %297 = vmatprep.mubr.msk.bf16.mxu0 %vm392_vm0, %v391_v0  ;;  %v42_v2 = vld [vmem:[%s484_s0] sm:$0xff]  ;;  %v325_v5 = vld [vmem:[%s487_s3 + $0x8] sm:$0xff]   ;;  %vm133_vm2 = vcmask 261120   ;;  %vm256_vm3 = vcmask 64512  }
  0x15   :  { %301 = vmatprep.subr.bf16.mxu1 %v391_v0  ;;  %305 = vmatprep.mubr.msk.bf16.mxu1 %vm392_vm0, %v391_v0  ;;  %v43_v3 = vpack.c.bf16 %v42_v2, %v42_v2  ;;  %v324_v4 = vld [vmem:[%s487_s3] sm:$0xff]   ;;  %v327_v18 = vld [vmem:[%s489_s5 + $0x8] sm:$0xff]  }
  0x16   :  { %296 = vmatpush3.bf16.msra.mxu0 %v323_v1  ;;  %302 = vmatpush3.bf16.msra.mxu1 %v324_v4  ;;  %v273_v6 = vld [vmem:[%s486_s2] ss:$0 sm:$0xff] }
  0x17   :  { %309 = vmatprep.subr.bf16.mxu0 %v391_v0  ;;  %303 = vmatprep.subr.bf16.mxu1 %v391_v0  ;;  %v326_v17 = vld [vmem:[%s489_s5] sm:$0xff]  }
  0x18   :  { %v277_v19 = vld [vmem:[%s488_s4] ss:$0 sm:$0xff]  ;;  %s393_s4 = smov [#allocation5]  }
  0x19   :  { %298 = vmatmul.mubr.msk.bf16.vlgmr.msra.gmra.mrb[0].mxu0 %vm59_vm1, %v43_v3  ;;  %v282_v30 = vld [vmem:[%s490_s6] ss:$0 sm:$0xff]  ;;  %s264_s26 = sshll.u32 %s393_s4, 4  ;;  %s265_s26 = int_to_ptr.vmem [resolvable:$true] %s264_s26 }
  0x1a   :  { %313 = vmatprep.mubr.msk.bf16.mxu0 %vm392_vm0, %v391_v0  ;;  %304 = vmatpush3.bf16.msra.mxu1 %v325_v5  ;;  %s362_s27 = scalar_lea.vmem %s265_s26, 128  ;;  %p367_p9 = scmp.lt.s32.totalorder %s265_s26, %s265_s26 }
  0x1b   :  { %310 = vmatpush3.bf16.msra.mxu0 %v326_v17  ;;  %p363_p8 = scmp.ne.s32.totalorder %s265_s26, %s362_s27  ;;  %p368_p10 = scmp.lt.s32.totalorder %s362_s27, %s362_s27 }
  0x1c   :  { %311 = vmatprep.subr.bf16.mxu0 %v391_v0 }
  0x1d   :  { %p369_p11 = por %p368_p10, %p367_p9 }
  0x1f   :  { %312 = vmatpush3.bf16.msra.mxu0 %v327_v18  ;;  %p370_p12 = pnand %p369_p11, %p363_p8 }
  0xec   :  { %v97_v7 = vpop.f32.mrb[0].mxu0 }
  0xed   :  { %v98_v8 = vadd.f32 %v273_v6, %v97_v7  ;;  %v299_v9 = vpop.f32.mrb[1].mxu0 }
  0xee   :  { %v100_v10 = vpop.f32.mrb[2].mxu0 }
  0xef   :  { %v276_v11 = vmul.f32 -1.442695, %v98_v8  ;;  %v300_v12 = vpop.f32.mrb[3].mxu0 }
  0xf1   :  { %328 = vpow2.f32 %v276_v11 }
  0xfb   :  { %v329_v13 = vpop.eup %328 }
  0xfc   :  { %v106_v14 = vadd.f32 1.0, %v329_v13 }
  0xfe   :  { %330 = vrcp.f32 %v106_v14 }
 0x108   :  { %v331_v15 = vpop.eup %330 }
 0x109   :  { %v109_v16 = vpack.c.bf16 %v331_v15, %v331_v15 }
 0x10b   :  { %306 = vmatmul.mubr.msk.bf16.vlgmr.msra.gmra.mrb[0].mxu1 %vm133_vm2, %v109_v16 }
 0x1de   :  { %v171_v20 = vpop.f32.mrb[0].mxu1 }
 0x1df   :  { %v172_v21 = vadd.f32 %v277_v19, %v171_v20  ;;  %v307_v22 = vpop.f32.mrb[1].mxu1 }
 0x1e0   :  { %v174_v23 = vpop.f32.mrb[2].mxu1 }
 0x1e1   :  { %v281_v24 = vmul.f32 -1.442695, %v172_v21  ;;  %v308_v25 = vpop.f32.mrb[3].mxu1 }
 0x1e3   :  { %332 = vpow2.f32 %v281_v24 }
 0x1ed   :  { %v333_v26 = vpop.eup %332 }
 0x1ee   :  { %v180_v27 = vadd.f32 1.0, %v333_v26 }
 0x1f0   :  { %334 = vrcp.f32 %v180_v27 }
 0x1fa   :  { %v335_v28 = vpop.eup %334 }
 0x1fb   :  { %v183_v29 = vpack.c.bf16 %v335_v28, %v335_v28 }
 0x1fd   :  { %314 = vmatmul.mubr.msk.bf16.vlgmr.msra.gmra.mrb[4].mxu0 %vm133_vm2, %v183_v29 }
 0x2d0   :  { %v244_v31 = vpop.f32.mrb[4].mxu0 }
 0x2d1   :  { %v245_v32 = vadd.f32 %v282_v30, %v244_v31  ;;  %v315_v33 = vpop.f32.mrb[5].mxu0 }
 0x2d2   :  { %v247_v34 = vpop.f32.mrb[6].mxu0 }
 0x2d3   :  { %v286_v35 = vmul.f32 -1.442695, %v245_v32  ;;  %v316_v36 = vpop.f32.mrb[7].mxu0 }
 0x2d5   :  { %336 = vpow2.f32 %v286_v35 }
 0x2df   :  { %v337_v37 = vpop.eup %336 }
 0x2e0   :  { %v253_v38 = vadd.f32 1.0, %v337_v37 }
 0x2e2   :  { %338 = vrcp.f32 %v253_v38 }
 0x2ec   :  { %v339_v39 = vpop.eup %338 }
 0x2ed   :  { %257 = vst.msk [vmem:[#allocation5] sm:$0xff] %vm256_vm3, %v339_v39 }
 0x2ee   :  { %373 = shalt.err (!%p370_p12)
}
 0x2ef   :  { %s374_s29 = scalar_lea.hbm %s491_s7, 128 }
 0x2f0   :  { %p375_p13 = scmp.ne.s32.totalorder %s491_s7, %s374_s29  ;;  %p378_p0 = scmp.lt.u32.totalorder %s374_s29, %s491_s7 }
 0x2f2   :  { %p380_p1 = pnand %p378_p0, %p375_p13 }
 0x2f4   :  { %383 = shalt.err (!%p380_p1)
}
 0x2f5   :  { %267 = dma.vmem_to_hbm [thread:$0]  %s265_s26, 128, %s491_s7, [#allocation4]  }
 0x2f6   :  { %386 = dma.done.wait [#allocation4], 128  }
 0x2f7   :  { %387 = vsyncadd [#allocation4], 4294967168 }
 0x2f8   :  { %271 = vsyncpa [#allocation3], 1 }
 0x2f9   :  { %272 = vsyncpa [#allocation4], 1 }

</bundles_post_ra>
